<compile_context>
chip_gen: v7x
topology: tpu7x:2x2x1
jax: 0.10.0
libtpu: 0.0.40
codegen_flags: <defaults>
</compile_context>

<pallas_src>
import math
from functools import partial

import jax
import jax.numpy as jnp
from jax.experimental import pallas as pl
from jax.experimental.pallas import tpu as pltpu


# ---------------- generation-aware budgets (queried once, trace-time) --------
def _vmem_capacity_bytes():
    try:
        return int(pltpu.get_tpu_info().vmem_capacity_bytes)
    except Exception:
        return 64 * 1024 * 1024  # conservative (v7x-sized) fallback


_VMEM_CAP = _vmem_capacity_bytes()
# ~3 MiB/buffer on v7x (64 MiB VMEM), ~6 MiB/buffer on v5e/v6e (128 MiB VMEM).
_TILE_BUDGET = min(6 * 1024 * 1024, max(1 * 1024 * 1024, _VMEM_CAP // 20))


# ---------------- kernels -----------------------------------------------------
def _drop_path_kernel(x_ref, s_ref, o_ref):
    """x_ref/o_ref: (GB, TR, TC); s_ref: (GB, 1, 1) per-sample keep/scale."""
    dt = o_ref.dtype
    o_ref[...] = x_ref[...].astype(dt) * s_ref[...].astype(dt)


def _drop_path_residual_kernel(x_ref, r_ref, s_ref, o_ref):
    """Fused residual add: out = skip + scale * branch (single HBM pass)."""
    dt = o_ref.dtype
    o_ref[...] = r_ref[...].astype(dt) + x_ref[...].astype(dt) * s_ref[...].astype(dt)


# ---------------- tiling ------------------------------------------------------
def _slab_and_tiles(B, n, itemsize):
    """Zero-copy factorization n == rows*lane plus (GB, TR, TC) block sizes."""
    rows, lane = 1, n
    for cand in (1024, 512, 256, 128):
        if n % cand == 0:
            rows, lane = n // cand, cand
            break

    # Lane-dim tiling is only needed for the rare ragged-and-huge case
    # (lane == n, not a multiple of 128, bigger than the tile budget).
    if lane % 128 != 0 and lane * itemsize > _TILE_BUDGET:
        tc = max(128, (_TILE_BUDGET // itemsize) // 128 * 128)
    else:
        tc = lane

    # Sublane tiling rounded to the dtype's native packing (8/16/32 rows).
    sub = max(8, 32 // itemsize)
    budget_rows = max(sub, (_TILE_BUDGET // max(1, tc * itemsize)) // sub * sub)
    tr = rows if rows <= budget_rows else budget_rows

    # Pack several batch samples per grid step when a whole sample fits.
    gb = 1
    if tr == rows and tc == lane:
        gb = max(1, min(B, _TILE_BUDGET // max(1, rows * lane * itemsize)))
    return rows, lane, gb, tr, tc


# ---------------- functional wrapper -----------------------------------------
@partial(jax.jit, static_argnames=("p", "training"))
def drop_path_pallas(x, p=0.0, training=False, *, key=None, residual=None):
    """Functional drop_path matching the PyTorch reference semantics.

    If `residual` is given, returns residual + drop_path(x) fused in-kernel.
    """
    if p == 0.0 or not training:
        return x if residual is None else x + residual
    if key is None:
        raise ValueError("key required when training with p > 0")
    keep_prob = 1.0 - float(p)

    orig_shape = x.shape
    B = x.shape[0]
    n = math.prod(x.shape[1:]) if x.ndim > 1 else 1

    out_dtype = (x.dtype if residual is None
                 else jnp.result_type(x.dtype, residual.dtype))

    # Per-sample keep/scale: floor(keep_prob + U[0,1)) in {0,1} == Bernoulli(keep_prob).
    u = jax.random.uniform(key, (B,), dtype=jnp.float32)
    scale = (jnp.floor(keep_prob + u) / jnp.float32(keep_prob)).reshape(B, 1, 1)

    itemsize = max(
        x.dtype.itemsize,
        jnp.dtype(out_dtype).itemsize,
        residual.dtype.itemsize if residual is not None else 0,
    )
    rows, lane, gb, tr, tc = _slab_and_tiles(B, n, itemsize)

    # Zero-copy reshapes: rows * lane == n exactly (no pad, no post-slice).
    x3 = x.reshape(B, rows, lane)
    data_spec = pl.BlockSpec((gb, tr, tc), lambda b, r, c: (b, r, c))
    scale_spec = pl.BlockSpec((gb, 1, 1), lambda b, r, c: (b, 0, 0))

    operands = [x3]
    in_specs = [data_spec]
    if residual is not None:
        operands.append(residual.reshape(B, rows, lane))
        in_specs.append(data_spec)
        kernel = _drop_path_residual_kernel
        n_streams = 3
    else:
        kernel = _drop_path_kernel
        n_streams = 2
    operands.append(scale)
    in_specs.append(scale_spec)

    grid = (pl.cdiv(B, gb), pl.cdiv(rows, tr), pl.cdiv(lane, tc))

    block_bytes = gb * tr * tc * itemsize
    live_bytes = n_streams * 2 * block_bytes + 4096  # double-buffered streams
    vmem_limit = int(max(32 * 1024 * 1024, live_bytes + 8 * 1024 * 1024))

    out = pl.pallas_call(
        kernel,
        out_shape=jax.ShapeDtypeStruct((B, rows, lane), out_dtype),
        grid=grid,
        in_specs=in_specs,
        out_specs=data_spec,
        compiler_params=pltpu.CompilerParams(
            dimension_semantics=("parallel", "parallel", "parallel"),
            vmem_limit_bytes=vmem_limit,
        ),
    )(*operands)

    return out.reshape(orig_shape)


class DropPath:
    """Drop paths (Stochastic Depth) per sample. Mirrors the PyTorch module."""

    def __init__(self, p: float = 0.1):
        self.drop_prob = p
        self.training = True  # PyTorch default after .train()

    def __call__(self, x, *, key=None, residual=None):
        return drop_path_pallas(
            x, p=self.drop_prob, training=self.training, key=key, residual=residual
        )


if __name__ == "__main__":
    key = jax.random.PRNGKey(0)
    k_data, k_skip, k_mask, k_mask2, k_mask3 = jax.random.split(key, 5)

    B, C, H, W = 2, 4, 16, 16
    x = jax.random.normal(k_data, (B, C, H, W), dtype=jnp.float32)
    skip = jax.random.normal(k_skip, (B, C, H, W), dtype=jnp.float32)

    layer = DropPath(p=0.1)
    keep_prob = 1.0 - layer.drop_prob

    # --- standalone DropPath (training) ---
    y = jax.block_until_ready(layer(x, key=k_mask))
    u = jax.random.uniform(k_mask, (B,), dtype=jnp.float32)
    mask = jnp.floor(keep_prob + u).reshape(B, 1, 1, 1)
    y_ref = x / keep_prob * mask
    assert jnp.allclose(y, y_ref, atol=1e-5, rtol=1e-5), "standalone mismatch"

    # --- fused residual-add variant (perf path for residual blocks) ---
    y_fused = jax.block_until_ready(layer(x, key=k_mask, residual=skip))
    assert jnp.allclose(y_fused, skip + y_ref, atol=1e-5, rtol=1e-5), "fused mismatch"

    # --- non-128-aligned spatial size (ragged path: no pad, no slice) ---
    x_odd = jax.random.normal(k_data, (2, 3, 14, 14), dtype=jnp.float32)
    y_odd = jax.block_until_ready(layer(x_odd, key=k_mask2))
    u2 = jax.random.uniform(k_mask2, (2,), dtype=jnp.float32)
    mask2 = jnp.floor(keep_prob + u2).reshape(2, 1, 1, 1)
    assert jnp.allclose(y_odd, x_odd / keep_prob * mask2, atol=1e-5, rtol=1e-5), "ragged mismatch"

    # --- bf16: native-dtype compute in-kernel ---
    x_bf = x.astype(jnp.bfloat16)
    y_bf = jax.block_until_ready(layer(x_bf, key=k_mask3))
    u3 = jax.random.uniform(k_mask3, (B,), dtype=jnp.float32)
    mask3 = jnp.floor(keep_prob + u3).reshape(B, 1, 1, 1)
    y_bf_ref = (x_bf.astype(jnp.float32) / keep_prob * mask3).astype(jnp.bfloat16)
    assert jnp.allclose(y_bf.astype(jnp.float32), y_bf_ref.astype(jnp.float32),
                        atol=5e-2, rtol=5e-2), "bf16 mismatch"

    # --- eval mode: pass-through ---
    layer.training = False
    y_eval = jax.block_until_ready(layer(x))
    assert jnp.allclose(y_eval, x), "eval mismatch"

    print("KERNEL_OK")
</pallas_src>

<mosaic_0001>
module attributes {stable_mosaic.version = 11 : i64} {
  func.func @_drop_path_kernel(%arg0: i32, %arg1: i32, %arg2: i32, %arg3: memref<2x1x1024xf32, #tpu.memory_space<vmem>>, %arg4: memref<2x1x1xf32, #tpu.memory_space<vmem>>, %arg5: memref<2x1x1024xf32, #tpu.memory_space<vmem>>) attributes {dimension_semantics = [#tpu.dimension_semantics<parallel>, #tpu.dimension_semantics<parallel>, #tpu.dimension_semantics<parallel>], iteration_bounds = array<i64: 1, 1, 1>, scalar_prefetch = 0 : i64, scratch_operands = 0 : i64, tpu.core_type = #tpu.core_type<tc>, window_params = [{transform_indices = @transform_0, window_bounds = array<i64: 2, 1, 1024>}, {transform_indices = @transform_1, window_bounds = array<i64: 2, 1, 1>}, {transform_indices = @transform_2, window_bounds = array<i64: 2, 1, 1024>}]} {
    %c0 = arith.constant 0 : index
    %c0_0 = arith.constant 0 : index
    %c0_1 = arith.constant 0 : index
    %0 = vector.load %arg3[%c0, %c0_0, %c0_1] : memref<2x1x1024xf32, #tpu.memory_space<vmem>>, vector<2x1x1024xf32>
    %c0_2 = arith.constant 0 : index
    %c0_3 = arith.constant 0 : index
    %c0_4 = arith.constant 0 : index
    %1 = vector.load %arg4[%c0_2, %c0_3, %c0_4] : memref<2x1x1xf32, #tpu.memory_space<vmem>>, vector<2x1x1xf32>
    %2 = vector.broadcast %1 : vector<2x1x1xf32> to vector<2x1x1024xf32>
    %3 = arith.mulf %0, %2 : vector<2x1x1024xf32>
    %c0_5 = arith.constant 0 : index
    %c0_6 = arith.constant 0 : index
    %c0_7 = arith.constant 0 : index
    %4 = vector.load %arg5[%c0_5, %c0_6, %c0_7] : memref<2x1x1024xf32, #tpu.memory_space<vmem>>, vector<2x1x1024xf32>
    tpu.vector_store %arg5[%c0_5, %c0_6, %c0_7], %3 {strides = array<i32>} : memref<2x1x1024xf32, #tpu.memory_space<vmem>>, vector<2x1x1024xf32>,
    return
  }
  func.func @transform_0(%arg0: i32, %arg1: i32, %arg2: i32) -> (i32, i32, i32) {
    %c0_i32 = arith.constant 0 : i32
    return %arg0, %arg1, %arg2 : i32, i32, i32
  }
  func.func @transform_1(%arg0: i32, %arg1: i32, %arg2: i32) -> (i32, i32, i32) {
    %c0_i32 = arith.constant 0 : i32
    %c0_i32_0 = arith.constant 0 : i32
    %c0_i32_1 = arith.constant 0 : i32
    return %arg0, %c0_i32, %c0_i32_0 : i32, i32, i32
  }
  func.func @transform_2(%arg0: i32, %arg1: i32, %arg2: i32) -> (i32, i32, i32) {
    %c0_i32 = arith.constant 0 : i32
    return %arg0, %arg1, %arg2 : i32, i32, i32
  }
}

</mosaic_0001>

<bundles_post_ra>
// kernel: drop_path_pallas.1
= control target key start
LH: loop header
LB: loop body
LE: loop exit
PB: predicated region body
PF: predicated region fallthrough
CT: control target
= control target key end

     0   :  { %v43_v0 = vmov 0   ;;  %v20_v3 = vlaneseq  ;;  %s77_s1 = inlined_call_operand.vmem [shape: f32[2,1,1], index: 1, kind: input, shape index: {}]   ;;  %s78_s0 = inlined_call_operand.vmem [shape: f32[2,1,1024], index: 0, kind: input, shape index: {}]   ;;  %s79_s2 = inlined_call_operand.vmem [shape: f32[2,1,1024], index: 2, kind: output, shape index: {}]  }
   0x1   :  { %42 = vset.pattern.permute.xlu0 %v43_v0  ;;  %v13_v1 = vld [vmem:[%s77_s1] sm:$0x1]  ;;  %v14_v2 = vld [vmem:[%s77_s1 + $0x1] sm:$0x1]  ;;  %v12_v11 = vld [vmem:[%s78_s0 + $0x8] sm:$0xff] }
   0x2   :  { %17 = vperm.xlu0 %42, %v13_v1   ;;  %v21_v4 = vshrl.u32 %v20_v3, 7  ;;  %v11_v7 = vld [vmem:[%s78_s0] sm:$0xff] }
   0x4   :  { %v22_v5 = vsub.s32 0, %v21_v4 }
   0x6   :  { %26 = vperm.xlu0 %42, %v14_v2  }
  0x81   :  { %v18_v6 = vpop.permute.xlu0 %17 }
  0x82   :  { %v23_v8 = vrot.slane %v18_v6, %v22_v5 }
  0x84   :  { %v33_v9 = vmul.f32 %v23_v8, %v11_v7 }
  0x85   :  { %v27_v10 = vpop.permute.xlu0 %26 }
  0x86   :  { %35 = vst [vmem:[%s79_s2] sm:$0xff] %v33_v9  ;;  %v32_v12 = vrot.slane %v27_v10, %v22_v5 }
  0x88   :  { %v34_v13 = vmul.f32 %v32_v12, %v12_v11 }
  0x8a   :  { %36 = vst [vmem:[%s79_s2 + $0x8] sm:$0xff] %v34_v13 }

</bundles_post_ra>
